<compile_context>
chip_gen: v6e
topology: v6e:2x2x1
jax: 0.10.0
libtpu: 0.0.40
codegen_flags: <defaults>
</compile_context>

<pallas_src>
import math

import jax
import jax.numpy as jnp
from jax.experimental import pallas as pl
from jax.experimental.pallas import tpu as pltpu

LANE = 128  # lane (last-dim) alignment


def _round_up(n, m):
    return ((n + m - 1) // m) * m


def _vmem_capacity_bytes():
    try:
        return int(pltpu.get_tpu_info().vmem_capacity_bytes)
    except Exception:
        return 64 << 20  # conservative default (v7x per-TensorCore VMEM)


def make_mlp_kernel(n_layers):
    """Kernel refs: (x, w0, b0, w1, b1, ..., w_{L-1}, b_{L-1}, out)."""
    def kernel(*refs):
        x_ref = refs[0]
        o_ref = refs[-1]
        p_refs = refs[1:-1]
        h = x_ref[...]                                    # (bm, in_pad)
        for l in range(n_layers):
            w_ref = p_refs[2 * l]
            b_ref = p_refs[2 * l + 1]                     # (1, out_pad_l), f32
            h = jnp.dot(h.astype(w_ref.dtype), w_ref[...],
                        preferred_element_type=jnp.float32)
            h = h + b_ref[...]                            # f32 bias add (VPU)
        o_ref[...] = h.astype(o_ref.dtype)                # one lane-dense store
    return kernel


class PreparedMLP:
    """Padded / cast parameters, computed ONCE (hoisted out of the call path)."""

    def __init__(self, weights, biases, compute_dtype=None):
        self.weights = list(weights)   # originals, for the small-batch fallback
        self.biases = list(biases)
        self.in_dim = weights[0].shape[0]
        self.out_dim = weights[-1].shape[1]
        self.wdtype = jnp.dtype(weights[0].dtype if compute_dtype is None
                                else compute_dtype)

        self.in_pad = _round_up(self.in_dim, LANE)
        padded_ws, padded_bs = [], []
        prev_pad = self.in_pad
        for w, b in zip(weights, biases):
            fi, fo = w.shape
            fo_pad = _round_up(fo, LANE)
            wp = jnp.zeros((prev_pad, fo_pad), self.wdtype)
            wp = wp.at[:fi, :fo].set(w.astype(self.wdtype))
            bp = jnp.zeros((1, fo_pad), jnp.float32).at[:, :fo].set(
                b.astype(jnp.float32))
            padded_ws.append(wp)
            padded_bs.append(bp)
            prev_pad = fo_pad
        self.out_pad = prev_pad
        self.padded_ws = padded_ws
        self.padded_bs = padded_bs
        self.resident_bytes = sum(int(a.size) * a.dtype.itemsize
                                  for a in padded_ws + padded_bs)
        self.max_pad = max([self.in_pad] + [w.shape[1] for w in padded_ws])


def prepare_params(weights, biases, compute_dtype=None):
    return PreparedMLP(weights, biases, compute_dtype=compute_dtype)


def _resident_spec(shape, single_buffer):
    # Weights/biases stay VMEM-resident across the batch grid (constant
    # index_map); single-buffer them to halve their VMEM footprint.
    if single_buffer:
        return pl.BlockSpec(shape, lambda i: (0, 0), pipeline_mode=pl.Buffered(1))
    return pl.BlockSpec(shape, lambda i: (0, 0))


def mlp_forward(x, prepared, *, block_m=None, force_pallas=False,
                min_pallas_batch=128):
    """x: (B, in_dim) float array.  prepared: PreparedMLP."""
    batch, in_dim = x.shape
    assert in_dim == prepared.in_dim

    # Small-batch escape hatch: at tiny M the kernel is launch/DMA-latency
    # bound and the MXU is <10% occupied; the plain XLA chain is cheaper.
    if batch < min_pallas_batch and not force_pallas:
        h = x
        for w, b in zip(prepared.weights, prepared.biases):
            h = h @ w + b
        return h

    wdtype = prepared.wdtype
    in_pad, out_pad = prepared.in_pad, prepared.out_pad
    out_dtype = x.dtype

    # ---- dtype-aware tile sizing under the per-generation VMEM budget ----
    sublane = 16 if wdtype == jnp.bfloat16 else 8
    if block_m is None:
        block_m = 1024 if wdtype == jnp.bfloat16 else 512

    cap = _vmem_capacity_bytes()
    budget = int(cap * 0.75)
    x_isz = jnp.dtype(wdtype).itemsize
    o_isz = jnp.dtype(out_dtype).itemsize

    def vmem_need(bm):
        io = bm * (2 * in_pad * x_isz + 2 * out_pad * o_isz)  # double-buffered x/out
        interm = 2 * bm * prepared.max_pad * 4                # live f32 intermediates
        return prepared.resident_bytes + io + interm

    bm = min(block_m, _round_up(batch, sublane))
    while bm > sublane and vmem_need(bm) > budget:
        bm = max(sublane, _round_up(bm // 2, sublane))
    # TODO(synk): if the resident weight stack alone outgrows the budget (wide
    # hidden layers on v7x's 64 MiB VMEM), switch to a K/N-tiled grid with a
    # VMEM f32 accumulator instead of keeping every layer resident.

    # Cap batch-padding waste: spread batch evenly over the tiles it needs.
    n_tiles = math.ceil(batch / bm)
    bm = min(bm, _round_up(math.ceil(batch / n_tiles), sublane))
    # Guarantee >=2 grid steps when the batch allows it, so the "parallel"
    # axis can shard across megacore / v7x's two TensorCores.
    if batch > 2 * sublane and _round_up(batch, bm) // bm < 2:
        bm = max(sublane, _round_up(math.ceil(batch / 2), sublane))
    batch_pad = _round_up(batch, bm)
    grid = (batch_pad // bm,)

    # ---- per-call work: only x gets padded / cast ----
    xp = jnp.pad(x.astype(wdtype),
                 ((0, batch_pad - batch), (0, in_pad - in_dim)))

    args = [xp]
    for wp, bp in zip(prepared.padded_ws, prepared.padded_bs):
        args.append(wp)
        args.append(bp)

    flops = 2 * batch_pad * sum(w.shape[0] * w.shape[1]
                                for w in prepared.padded_ws)
    bytes_accessed = int(xp.size * xp.dtype.itemsize
                         + prepared.resident_bytes
                         + batch_pad * out_pad * o_isz)
    cost = pl.CostEstimate(flops=flops, transcendentals=0,
                           bytes_accessed=bytes_accessed)

    vmem_limit = int(min(cap, max(2 * vmem_need(bm) + (4 << 20), 48 << 20)))

    def _call(single_buffer_weights):
        in_specs = [pl.BlockSpec((bm, in_pad), lambda i: (i, 0))]
        for wp, bp in zip(prepared.padded_ws, prepared.padded_bs):
            in_specs.append(_resident_spec(wp.shape, single_buffer_weights))
            in_specs.append(_resident_spec(bp.shape, single_buffer_weights))
        out_spec = pl.BlockSpec((bm, out_pad), lambda i: (i, 0))
        return pl.pallas_call(
            make_mlp_kernel(len(prepared.padded_ws)),
            grid=grid,
            in_specs=in_specs,
            out_specs=out_spec,
            out_shape=jax.ShapeDtypeStruct((batch_pad, out_pad), out_dtype),
            compiler_params=pltpu.CompilerParams(
                dimension_semantics=("parallel",),
                vmem_limit_bytes=vmem_limit),
            cost_estimate=cost,
        )(*args)

    try:
        out = _call(True)    # single-buffered resident weights/biases
    except Exception:
        out = _call(False)   # fallback: default double-buffering

    return out[:batch, :prepared.out_dim]


def init_params(key, input_size, output_size, hidden=2):
    """Deterministic init mimicking nn.Linear's uniform(-1/sqrt(fan_in), ...)."""
    dims = [input_size, 100] + [100] * hidden + [output_size]
    weights, biases = [], []
    for i in range(len(dims) - 1):
        fan_in, fan_out = dims[i], dims[i + 1]
        key, kw, kb = jax.random.split(key, 3)
        bound = 1.0 / math.sqrt(fan_in)
        w = jax.random.uniform(kw, (fan_in, fan_out), jnp.float32, -bound, bound)
        b = jax.random.uniform(kb, (fan_out,), jnp.float32, -bound, bound)
        weights.append(w)
        biases.append(b)
    return weights, biases


def reference_forward(x, weights, biases):
    h = x
    for w, b in zip(weights, biases):
        h = h @ w + b
    return h


if __name__ == "__main__":
    key = jax.random.PRNGKey(0)

    batch, input_size, output_size, hidden = 8, 32, 10, 2
    key, kx = jax.random.split(key)
    x = jax.random.normal(kx, (batch, input_size), jnp.float32)

    weights, biases = init_params(key, input_size, output_size, hidden)
    ref = reference_forward(x, weights, biases)

    # One-time padding / cast of parameters (hoisted out of the call path).
    params_f32 = prepare_params(weights, biases)
    params_bf16 = prepare_params(weights, biases, compute_dtype=jnp.bfloat16)

    # (1) Small batch, forcing the Pallas path so the kernel is exercised.
    out_f32 = jax.block_until_ready(mlp_forward(x, params_f32, force_pallas=True))
    assert out_f32.shape == (batch, output_size)
    assert jnp.allclose(out_f32, ref, atol=1e-4, rtol=1e-4), "f32 mismatch"

    # (2) Small batch through the escape hatch (plain XLA chain, same math).
    out_small = jax.block_until_ready(mlp_forward(x, params_f32))
    assert jnp.allclose(out_small, ref, atol=1e-4, rtol=1e-4), "fallback mismatch"

    # (3) Larger batch: >=2-step parallel grid + bf16 weights / f32 accumulate.
    key, kb = jax.random.split(key)
    x_big = jax.random.normal(kb, (384, input_size), jnp.float32)
    ref_big = reference_forward(x_big, weights, biases)
    out_big = jax.block_until_ready(mlp_forward(x_big, params_bf16))
    assert out_big.shape == (384, output_size)
    assert jnp.allclose(out_big, ref_big, atol=1e-1, rtol=1e-1), "bf16 mismatch"

    print("KERNEL_OK")
</pallas_src>

<mosaic_0001>
module attributes {stable_mosaic.version = 11 : i64} {
  func.func @kernel(%arg0: i32, %arg1: memref<8x128xf32, #tpu.memory_space<vmem>>, %arg2: memref<128x128xf32, #tpu.memory_space<vmem>>, %arg3: memref<1x128xf32, #tpu.memory_space<vmem>>, %arg4: memref<128x128xf32, #tpu.memory_space<vmem>>, %arg5: memref<1x128xf32, #tpu.memory_space<vmem>>, %arg6: memref<128x128xf32, #tpu.memory_space<vmem>>, %arg7: memref<1x128xf32, #tpu.memory_space<vmem>>, %arg8: memref<128x128xf32, #tpu.memory_space<vmem>>, %arg9: memref<1x128xf32, #tpu.memory_space<vmem>>, %arg10: memref<8x128xf32, #tpu.memory_space<vmem>>) attributes {dimension_semantics = [#tpu.dimension_semantics<parallel>], iteration_bounds = array<i64: 1>, scalar_prefetch = 0 : i64, scratch_operands = 0 : i64, tpu.core_type = #tpu.core_type<tc>, window_params = [{transform_indices = @transform_0, window_bounds = array<i64: 8, 128>}, {pipeline_mode = #tpu.pipeline_mode<synchronous>, transform_indices = @transform_1, window_bounds = array<i64: 128, 128>}, {pipeline_mode = #tpu.pipeline_mode<synchronous>, transform_indices = @transform_2, window_bounds = array<i64: 1, 128>}, {pipeline_mode = #tpu.pipeline_mode<synchronous>, transform_indices = @transform_3, window_bounds = array<i64: 128, 128>}, {pipeline_mode = #tpu.pipeline_mode<synchronous>, transform_indices = @transform_4, window_bounds = array<i64: 1, 128>}, {pipeline_mode = #tpu.pipeline_mode<synchronous>, transform_indices = @transform_5, window_bounds = array<i64: 128, 128>}, {pipeline_mode = #tpu.pipeline_mode<synchronous>, transform_indices = @transform_6, window_bounds = array<i64: 1, 128>}, {pipeline_mode = #tpu.pipeline_mode<synchronous>, transform_indices = @transform_7, window_bounds = array<i64: 128, 128>}, {pipeline_mode = #tpu.pipeline_mode<synchronous>, transform_indices = @transform_8, window_bounds = array<i64: 1, 128>}, {transform_indices = @transform_9, window_bounds = array<i64: 8, 128>}]} {
    %c0 = arith.constant 0 : index
    %c0_0 = arith.constant 0 : index
    %0 = vector.load %arg1[%c0, %c0_0] : memref<8x128xf32, #tpu.memory_space<vmem>>, vector<8x128xf32>
    %c0_1 = arith.constant 0 : index
    %c0_2 = arith.constant 0 : index
    %1 = vector.load %arg2[%c0_1, %c0_2] : memref<128x128xf32, #tpu.memory_space<vmem>>, vector<128x128xf32>
    %cst = arith.constant dense<0.000000e+00> : vector<8x128xf32>
    %2 = tpu.matmul %0, %1, %cst {dimension_numbers = #tpu.dot_dimension_numbers<[1], [0], [0], [1], [0, 0, 1, 1], [], []>} : vector<8x128xf32>, vector<128x128xf32>, vector<8x128xf32> -> vector<8x128xf32>
    %c0_3 = arith.constant 0 : index
    %c0_4 = arith.constant 0 : index
    %3 = vector.load %arg3[%c0_3, %c0_4] : memref<1x128xf32, #tpu.memory_space<vmem>>, vector<1x128xf32>
    %4 = vector.broadcast %3 : vector<1x128xf32> to vector<8x128xf32>
    %5 = arith.addf %2, %4 : vector<8x128xf32>
    %c0_5 = arith.constant 0 : index
    %c0_6 = arith.constant 0 : index
    %6 = vector.load %arg4[%c0_5, %c0_6] : memref<128x128xf32, #tpu.memory_space<vmem>>, vector<128x128xf32>
    %cst_7 = arith.constant dense<0.000000e+00> : vector<8x128xf32>
    %7 = tpu.matmul %5, %6, %cst_7 {dimension_numbers = #tpu.dot_dimension_numbers<[1], [0], [0], [1], [0, 0, 1, 1], [], []>} : vector<8x128xf32>, vector<128x128xf32>, vector<8x128xf32> -> vector<8x128xf32>
    %c0_8 = arith.constant 0 : index
    %c0_9 = arith.constant 0 : index
    %8 = vector.load %arg5[%c0_8, %c0_9] : memref<1x128xf32, #tpu.memory_space<vmem>>, vector<1x128xf32>
    %9 = vector.broadcast %8 : vector<1x128xf32> to vector<8x128xf32>
    %10 = arith.addf %7, %9 : vector<8x128xf32>
    %c0_10 = arith.constant 0 : index
    %c0_11 = arith.constant 0 : index
    %11 = vector.load %arg6[%c0_10, %c0_11] : memref<128x128xf32, #tpu.memory_space<vmem>>, vector<128x128xf32>
    %cst_12 = arith.constant dense<0.000000e+00> : vector<8x128xf32>
    %12 = tpu.matmul %10, %11, %cst_12 {dimension_numbers = #tpu.dot_dimension_numbers<[1], [0], [0], [1], [0, 0, 1, 1], [], []>} : vector<8x128xf32>, vector<128x128xf32>, vector<8x128xf32> -> vector<8x128xf32>
    %c0_13 = arith.constant 0 : index
    %c0_14 = arith.constant 0 : index
    %13 = vector.load %arg7[%c0_13, %c0_14] : memref<1x128xf32, #tpu.memory_space<vmem>>, vector<1x128xf32>
    %14 = vector.broadcast %13 : vector<1x128xf32> to vector<8x128xf32>
    %15 = arith.addf %12, %14 : vector<8x128xf32>
    %c0_15 = arith.constant 0 : index
    %c0_16 = arith.constant 0 : index
    %16 = vector.load %arg8[%c0_15, %c0_16] : memref<128x128xf32, #tpu.memory_space<vmem>>, vector<128x128xf32>
    %cst_17 = arith.constant dense<0.000000e+00> : vector<8x128xf32>
    %17 = tpu.matmul %15, %16, %cst_17 {dimension_numbers = #tpu.dot_dimension_numbers<[1], [0], [0], [1], [0, 0, 1, 1], [], []>} : vector<8x128xf32>, vector<128x128xf32>, vector<8x128xf32> -> vector<8x128xf32>
    %c0_18 = arith.constant 0 : index
    %c0_19 = arith.constant 0 : index
    %18 = vector.load %arg9[%c0_18, %c0_19] : memref<1x128xf32, #tpu.memory_space<vmem>>, vector<1x128xf32>
    %19 = vector.broadcast %18 : vector<1x128xf32> to vector<8x128xf32>
    %20 = arith.addf %17, %19 : vector<8x128xf32>
    %c0_20 = arith.constant 0 : index
    %c0_21 = arith.constant 0 : index
    %21 = vector.load %arg10[%c0_20, %c0_21] : memref<8x128xf32, #tpu.memory_space<vmem>>, vector<8x128xf32>
    tpu.vector_store %arg10[%c0_20, %c0_21], %20 {strides = array<i32>} : memref<8x128xf32, #tpu.memory_space<vmem>>, vector<8x128xf32>,
    return
  }
  func.func @transform_0(%arg0: i32) -> (i32, i32) {
    %c0_i32 = arith.constant 0 : i32
    %c0_i32_0 = arith.constant 0 : i32
    return %arg0, %c0_i32 : i32, i32
  }
  func.func @transform_1(%arg0: i32) -> (i32, i32) {
    %c0_i32 = arith.constant 0 : i32
    %c0_i32_0 = arith.constant 0 : i32
    %c0_i32_1 = arith.constant 0 : i32
    return %c0_i32, %c0_i32_0 : i32, i32
  }
  func.func @transform_2(%arg0: i32) -> (i32, i32) {
    %c0_i32 = arith.constant 0 : i32
    %c0_i32_0 = arith.constant 0 : i32
    %c0_i32_1 = arith.constant 0 : i32
    return %c0_i32, %c0_i32_0 : i32, i32
  }
  func.func @transform_3(%arg0: i32) -> (i32, i32) {
    %c0_i32 = arith.constant 0 : i32
    %c0_i32_0 = arith.constant 0 : i32
    %c0_i32_1 = arith.constant 0 : i32
    return %c0_i32, %c0_i32_0 : i32, i32
  }
  func.func @transform_4(%arg0: i32) -> (i32, i32) {
    %c0_i32 = arith.constant 0 : i32
    %c0_i32_0 = arith.constant 0 : i32
    %c0_i32_1 = arith.constant 0 : i32
    return %c0_i32, %c0_i32_0 : i32, i32
  }
  func.func @transform_5(%arg0: i32) -> (i32, i32) {
    %c0_i32 = arith.constant 0 : i32
    %c0_i32_0 = arith.constant 0 : i32
    %c0_i32_1 = arith.constant 0 : i32
    return %c0_i32, %c0_i32_0 : i32, i32
  }
  func.func @transform_6(%arg0: i32) -> (i32, i32) {
    %c0_i32 = arith.constant 0 : i32
    %c0_i32_0 = arith.constant 0 : i32
    %c0_i32_1 = arith.constant 0 : i32
    return %c0_i32, %c0_i32_0 : i32, i32
  }
  func.func @transform_7(%arg0: i32) -> (i32, i32) {
    %c0_i32 = arith.constant 0 : i32
    %c0_i32_0 = arith.constant 0 : i32
    %c0_i32_1 = arith.constant 0 : i32
    return %c0_i32, %c0_i32_0 : i32, i32
  }
  func.func @transform_8(%arg0: i32) -> (i32, i32) {
    %c0_i32 = arith.constant 0 : i32
    %c0_i32_0 = arith.constant 0 : i32
    %c0_i32_1 = arith.constant 0 : i32
    return %c0_i32, %c0_i32_0 : i32, i32
  }
  func.func @transform_9(%arg0: i32) -> (i32, i32) {
    %c0_i32 = arith.constant 0 : i32
    %c0_i32_0 = arith.constant 0 : i32
    return %arg0, %c0_i32 : i32, i32
  }
}

module attributes {stable_mosaic.version = 11 : i64} {
  func.func @kernel(%arg0: i32, %arg1: memref<8x128xf32, #tpu.memory_space<vmem>>, %arg2: memref<128x128xf32, #tpu.memory_space<vmem>>, %arg3: memref<1x128xf32, #tpu.memory_space<vmem>>, %arg4: memref<128x128xf32, #tpu.memory_space<vmem>>, %arg5: memref<1x128xf32, #tpu.memory_space<vmem>>, %arg6: memref<128x128xf32, #tpu.memory_space<vmem>>, %arg7: memref<1x128xf32, #tpu.memory_space<vmem>>, %arg8: memref<128x128xf32, #tpu.memory_space<vmem>>, %arg9: memref<1x128xf32, #tpu.memory_space<vmem>>, %arg10: memref<8x128xf32, #tpu.memory_space<vmem>>) attributes {dimension_semantics = [#tpu.dimension_semantics<parallel>], iteration_bounds = array<i64: 1>, scalar_prefetch = 0 : i64, scratch_operands = 0 : i64, tpu.core_type = #tpu.core_type<tc>, window_params = [{transform_indices = @transform_0, window_bounds = array<i64: 8, 128>}, {pipeline_mode = #tpu.pipeline_mode<synchronous>, transform_indices = @transform_1, window_bounds = array<i64: 128, 128>}, {pipeline_mode = #tpu.pipeline_mode<synchronous>, transform_indices = @transform_2, window_bounds = array<i64: 1, 128>}, {pipeline_mode = #tpu.pipeline_mode<synchronous>, transform_indices = @transform_3, window_bounds = array<i64: 128, 128>}, {pipeline_mode = #tpu.pipeline_mode<synchronous>, transform_indices = @transform_4, window_bounds = array<i64: 1, 128>}, {pipeline_mode = #tpu.pipeline_mode<synchronous>, transform_indices = @transform_5, window_bounds = array<i64: 128, 128>}, {pipeline_mode = #tpu.pipeline_mode<synchronous>, transform_indices = @transform_6, window_bounds = array<i64: 1, 128>}, {pipeline_mode = #tpu.pipeline_mode<synchronous>, transform_indices = @transform_7, window_bounds = array<i64: 128, 128>}, {pipeline_mode = #tpu.pipeline_mode<synchronous>, transform_indices = @transform_8, window_bounds = array<i64: 1, 128>}, {transform_indices = @transform_9, window_bounds = array<i64: 8, 128>}]} {
    %c0 = arith.constant 0 : index
    %c0_0 = arith.constant 0 : index
    %0 = vector.load %arg1[%c0, %c0_0] : memref<8x128xf32, #tpu.memory_space<vmem>>, vector<8x128xf32>
    %c0_1 = arith.constant 0 : index
    %c0_2 = arith.constant 0 : index
    %1 = vector.load %arg2[%c0_1, %c0_2] : memref<128x128xf32, #tpu.memory_space<vmem>>, vector<128x128xf32>
    %cst = arith.constant dense<0.000000e+00> : vector<8x128xf32>
    %2 = tpu.matmul %0, %1, %cst {dimension_numbers = #tpu.dot_dimension_numbers<[1], [0], [0], [1], [0, 0, 1, 1], [], []>} : vector<8x128xf32>, vector<128x128xf32>, vector<8x128xf32> -> vector<8x128xf32>
    %c0_3 = arith.constant 0 : index
    %c0_4 = arith.constant 0 : index
    %3 = vector.load %arg3[%c0_3, %c0_4] : memref<1x128xf32, #tpu.memory_space<vmem>>, vector<1x128xf32>
    %4 = vector.broadcast %3 : vector<1x128xf32> to vector<8x128xf32>
    %5 = arith.addf %2, %4 : vector<8x128xf32>
    %c0_5 = arith.constant 0 : index
    %c0_6 = arith.constant 0 : index
    %6 = vector.load %arg4[%c0_5, %c0_6] : memref<128x128xf32, #tpu.memory_space<vmem>>, vector<128x128xf32>
    %cst_7 = arith.constant dense<0.000000e+00> : vector<8x128xf32>
    %7 = tpu.matmul %5, %6, %cst_7 {dimension_numbers = #tpu.dot_dimension_numbers<[1], [0], [0], [1], [0, 0, 1, 1], [], []>} : vector<8x128xf32>, vector<128x128xf32>, vector<8x128xf32> -> vector<8x128xf32>
    %c0_8 = arith.constant 0 : index
    %c0_9 = arith.constant 0 : index
    %8 = vector.load %arg5[%c0_8, %c0_9] : memref<1x128xf32, #tpu.memory_space<vmem>>, vector<1x128xf32>
    %9 = vector.broadcast %8 : vector<1x128xf32> to vector<8x128xf32>
    %10 = arith.addf %7, %9 : vector<8x128xf32>
    %c0_10 = arith.constant 0 : index
    %c0_11 = arith.constant 0 : index
    %11 = vector.load %arg6[%c0_10, %c0_11] : memref<128x128xf32, #tpu.memory_space<vmem>>, vector<128x128xf32>
    %cst_12 = arith.constant dense<0.000000e+00> : vector<8x128xf32>
    %12 = tpu.matmul %10, %11, %cst_12 {dimension_numbers = #tpu.dot_dimension_numbers<[1], [0], [0], [1], [0, 0, 1, 1], [], []>} : vector<8x128xf32>, vector<128x128xf32>, vector<8x128xf32> -> vector<8x128xf32>
    %c0_13 = arith.constant 0 : index
    %c0_14 = arith.constant 0 : index
    %13 = vector.load %arg7[%c0_13, %c0_14] : memref<1x128xf32, #tpu.memory_space<vmem>>, vector<1x128xf32>
    %14 = vector.broadcast %13 : vector<1x128xf32> to vector<8x128xf32>
    %15 = arith.addf %12, %14 : vector<8x128xf32>
    %c0_15 = arith.constant 0 : index
    %c0_16 = arith.constant 0 : index
    %16 = vector.load %arg8[%c0_15, %c0_16] : memref<128x128xf32, #tpu.memory_space<vmem>>, vector<128x128xf32>
    %cst_17 = arith.constant dense<0.000000e+00> : vector<8x128xf32>
    %17 = tpu.matmul %15, %16, %cst_17 {dimension_numbers = #tpu.dot_dimension_numbers<[1], [0], [0], [1], [0, 0, 1, 1], [], []>} : vector<8x128xf32>, vector<128x128xf32>, vector<8x128xf32> -> vector<8x128xf32>
    %c0_18 = arith.constant 0 : index
    %c0_19 = arith.constant 0 : index
    %18 = vector.load %arg9[%c0_18, %c0_19] : memref<1x128xf32, #tpu.memory_space<vmem>>, vector<1x128xf32>
    %19 = vector.broadcast %18 : vector<1x128xf32> to vector<8x128xf32>
    %20 = arith.addf %17, %19 : vector<8x128xf32>
    %c0_20 = arith.constant 0 : index
    %c0_21 = arith.constant 0 : index
    %21 = vector.load %arg10[%c0_20, %c0_21] : memref<8x128xf32, #tpu.memory_space<vmem>>, vector<8x128xf32>
    tpu.vector_store %arg10[%c0_20, %c0_21], %20 {strides = array<i32>} : memref<8x128xf32, #tpu.memory_space<vmem>>, vector<8x128xf32>,
    return
  }
  func.func @transform_0(%arg0: i32) -> (i32, i32) {
    %c0_i32 = arith.constant 0 : i32
    %c0_i32_0 = arith.constant 0 : i32
    return %arg0, %c0_i32 : i32, i32
  }
  func.func @transform_1(%arg0: i32) -> (i32, i32) {
    %c0_i32 = arith.constant 0 : i32
    %c0_i32_0 = arith.constant 0 : i32
    %c0_i32_1 = arith.constant 0 : i32
    return %c0_i32, %c0_i32_0 : i32, i32
  }
  func.func @transform_2(%arg0: i32) -> (i32, i32) {
    %c0_i32 = arith.constant 0 : i32
    %c0_i32_0 = arith.constant 0 : i32
    %c0_i32_1 = arith.constant 0 : i32
    return %c0_i32, %c0_i32_0 : i32, i32
  }
  func.func @transform_3(%arg0: i32) -> (i32, i32) {
    %c0_i32 = arith.constant 0 : i32
    %c0_i32_0 = arith.constant 0 : i32
    %c0_i32_1 = arith.constant 0 : i32
    return %c0_i32, %c0_i32_0 : i32, i32
  }
  func.func @transform_4(%arg0: i32) -> (i32, i32) {
    %c0_i32 = arith.constant 0 : i32
    %c0_i32_0 = arith.constant 0 : i32
    %c0_i32_1 = arith.constant 0 : i32
    return %c0_i32, %c0_i32_0 : i32, i32
  }
  func.func @transform_5(%arg0: i32) -> (i32, i32) {
    %c0_i32 = arith.constant 0 : i32
    %c0_i32_0 = arith.constant 0 : i32
    %c0_i32_1 = arith.constant 0 : i32
    return %c0_i32, %c0_i32_0 : i32, i32
  }
  func.func @transform_6(%arg0: i32) -> (i32, i32) {
    %c0_i32 = arith.constant 0 : i32
    %c0_i32_0 = arith.constant 0 : i32
    %c0_i32_1 = arith.constant 0 : i32
    return %c0_i32, %c0_i32_0 : i32, i32
  }
  func.func @transform_7(%arg0: i32) -> (i32, i32) {
    %c0_i32 = arith.constant 0 : i32
    %c0_i32_0 = arith.constant 0 : i32
    %c0_i32_1 = arith.constant 0 : i32
    return %c0_i32, %c0_i32_0 : i32, i32
  }
  func.func @transform_8(%arg0: i32) -> (i32, i32) {
    %c0_i32 = arith.constant 0 : i32
    %c0_i32_0 = arith.constant 0 : i32
    %c0_i32_1 = arith.constant 0 : i32
    return %c0_i32, %c0_i32_0 : i32, i32
  }
  func.func @transform_9(%arg0: i32) -> (i32, i32) {
    %c0_i32 = arith.constant 0 : i32
    %c0_i32_0 = arith.constant 0 : i32
    return %arg0, %c0_i32 : i32, i32
  }
}

</mosaic_0001>

<bundles_post_ra>
// kernel: tpu_custom_call.1
= control target key start
LH: loop header
LB: loop body
LE: loop exit
PB: predicated region body
PF: predicated region fallthrough
CT: control target
= control target key end

     0   :  { %14 = vsyncpa [#allocation3], 0  ;;  %s1014_s0 = inlined_call_operand.hbm [shape: f32[8,128], index: 0, kind: input, shape index: {}]   ;;  %s1015_s1 = inlined_call_operand.hbm [shape: f32[128,128], index: 1, kind: input, shape index: {}]   ;;  %s1016_s2 = inlined_call_operand.vmem [shape: f32[1,128], index: 2, kind: input, shape index: {}]   ;;  %s1017_s3 = inlined_call_operand.hbm [shape: f32[128,128], index: 3, kind: input, shape index: {}]   ;;  %s1018_s4 = inlined_call_operand.vmem [shape: f32[1,128], index: 4, kind: input, shape index: {}]   ;;  %s1019_s5 = inlined_call_operand.hbm [shape: f32[128,128], index: 5, kind: input, shape index: {}]   ;;  %s1020_s6 = inlined_call_operand.vmem [shape: f32[1,128], index: 6, kind: input, shape index: {}]   ;;  %s1021_s7 = inlined_call_operand.hbm [shape: f32[128,128], index: 7, kind: input, shape index: {}]   ;;  %s1022_s8 = inlined_call_operand.vmem [shape: f32[1,128], index: 8, kind: input, shape index: {}]   ;;  %s1023_s9 = inlined_call_operand.hbm [shape: f32[8,128], index: 9, kind: output, shape index: {}]  }
   0x1   :  { %15 = vsyncpa [#allocation6], 0 }
   0x2   :  { %16 = vsyncpa [#allocation9], 0 }
   0x3   :  { %17 = vsyncpa [#allocation4], 0  ;;  %s840_s30 = smov [#allocation5]  }
   0x4   :  { %s33_s10 = sshll.u32 %s840_s30, 4  ;;  %s34_s10 = int_to_ptr.vmem [resolvable:$true] %s33_s10 }
   0x5   :  { %s720_s11 = scalar_lea.vmem %s34_s10, 2048  ;;  %p725_p1 = scmp.lt.s32.totalorder %s34_s10, %s34_s10 }
   0x6   :  { %p721_p0 = scmp.ne.s32.totalorder %s34_s10, %s720_s11  ;;  %p726_p2 = scmp.lt.s32.totalorder %s720_s11, %s720_s11 }
   0x8   :  { %p727_p3 = por %p726_p2, %p725_p1 }
   0xa   :  { %p728_p4 = pnand %p727_p3, %p721_p0 }
   0xc   :  { %731 = shalt.err (!%p728_p4)
}
   0xd   :  { %s841_s12 = smov 128   ;;  %s842_s13 = smov 8  }
   0xe   :  { %39 = dma.hbm_to_vmem [thread:$0]  %s1015_s1, 2048, %s34_s10, [#allocation6], %s841_s12, %s841_s12, %s842_s13  }
   0xf   :  { %s843_s16 = smov [#allocation8]   ;;  %s844_s18 = smov [#allocation2]  }
  0x10   :  { %s61_s17 = sshll.u32 %s843_s16, 4  ;;  %s24_s19 = sshll.u32 %s844_s18, 4  ;;  %s62_s17 = int_to_ptr.vmem [resolvable:$true] %s61_s17  ;;  %s25_s19 = int_to_ptr.vmem [resolvable:$true] %s24_s19 }
  0x11   :  { %s740_s20 = scalar_lea.vmem %s62_s17, 2048  ;;  %p745_p6 = scmp.lt.s32.totalorder %s62_s17, %s62_s17 }
  0x12   :  { %p741_p5 = scmp.ne.s32.totalorder %s62_s17, %s740_s20  ;;  %p746_p7 = scmp.lt.s32.totalorder %s740_s20, %s740_s20 }
  0x14   :  { %p747_p8 = por %p746_p7, %p745_p6 }
  0x16   :  { %p748_p9 = pnand %p747_p8, %p741_p5 }
  0x18   :  { %751 = shalt.err (!%p748_p9)
}
  0x19   :  { %67 = dma.hbm_to_vmem [thread:$0]  %s1019_s5, 2048, %s62_s17, [#allocation9], %s841_s12, %s841_s12, %s842_s13  }
  0x1a   :  { %s760_s1 = scalar_lea.vmem %s25_s19, 128  ;;  %p765_p11 = scmp.lt.s32.totalorder %s25_s19, %s25_s19 }
  0x1b   :  { %p761_p10 = scmp.ne.s32.totalorder %s25_s19, %s760_s1  ;;  %p766_p12 = scmp.lt.s32.totalorder %s760_s1, %s760_s1 }
  0x1d   :  { %p767_p13 = por %p766_p12, %p765_p11 }
  0x1f   :  { %p768_p0 = pnand %p767_p13, %p761_p10 }
  0x21   :  { %771 = shalt.err (!%p768_p0)
}
  0x22   :  { %27 = dma.hbm_to_vmem [thread:$0]  %s1014_s0, 128, %s25_s19, [#allocation3]  }
  0x23   :  { %s845_s25 = smov [#allocation7]   ;;  %s846_s27 = smov [#allocation10]  }
  0x24   :  { %s47_s26 = sshll.u32 %s845_s25, 4  ;;  %s75_s28 = sshll.u32 %s846_s27, 4  ;;  %s48_s26 = int_to_ptr.vmem [resolvable:$true] %s47_s26  ;;  %s76_s28 = int_to_ptr.vmem [resolvable:$true] %s75_s28 }
  0x25   :  { %s780_s29 = scalar_lea.vmem %s48_s26, 2048  ;;  %p785_p2 = scmp.lt.s32.totalorder %s48_s26, %s48_s26 }
  0x26   :  { %p781_p1 = scmp.ne.s32.totalorder %s48_s26, %s780_s29  ;;  %p786_p3 = scmp.lt.s32.totalorder %s780_s29, %s780_s29 }
  0x28   :  { %p787_p4 = por %p786_p3, %p785_p2 }
  0x2a   :  { %p788_p5 = pnand %p787_p4, %p781_p1 }
  0x2c   :  { %791 = shalt.err (!%p788_p5)
}
  0x2d   :  { %53 = dma.hbm_to_vmem [thread:$0]  %s1017_s3, 2048, %s48_s26, [#allocation6], %s841_s12, %s841_s12, %s842_s13  }
  0x2e   :  { %s800_s0 = scalar_lea.vmem %s76_s28, 2048  ;;  %p805_p7 = scmp.lt.s32.totalorder %s76_s28, %s76_s28 }
  0x2f   :  { %p801_p6 = scmp.ne.s32.totalorder %s76_s28, %s800_s0  ;;  %p806_p8 = scmp.lt.s32.totalorder %s800_s0, %s800_s0 }
  0x31   :  { %p807_p9 = por %p806_p8, %p805_p7 }
  0x33   :  { %p808_p10 = pnand %p807_p9, %p801_p6 }
  0x35   :  { %811 = shalt.err (!%p808_p10)
}
  0x36   :  { %81 = dma.hbm_to_vmem [thread:$0]  %s1021_s7, 2048, %s76_s28, [#allocation9], %s841_s12, %s841_s12, %s842_s13  }
  0x37   :  { %832 = dma.done.wait [#allocation3], 128  }
  0x38   :  { %833 = vsyncadd [#allocation3], 4294967168 }
  0x39   :  { %834 = dma.done.wait [#allocation6], 4096  }
  0x3a   :  { %835 = vsyncadd [#allocation6], 4294963200 }
  0x3b   :  { %836 = dma.done.wait [#allocation9], 4096  }
  0x3c   :  { %837 = vsyncadd [#allocation9], 4294963200  ;;  %v847_v0 = vmov 0.0   ;;  %vm848_vm0 = vmmov 0   ;;  %v115_v1 = vld [vmem:[#allocation5 + $0x78] sm:$0xff]  ;;  %v114_v2 = vld [vmem:[#allocation5 + $0x70] sm:$0xff] }
  0x3d   :  { %562 = vmatprep.subr.mxu0 %v847_v0  ;;  %594 = vmatprep.mubr.msk.f32.mxu0 %vm848_vm0, %v847_v0  ;;  %v113_v3 = vld [vmem:[#allocation5 + $0x68] sm:$0xff]  ;;  %v112_v4 = vld [vmem:[#allocation5 + $0x60] sm:$0xff]  ;;  %v208_v5 = vld [vmem:[#allocation7 + $0x78] sm:$0xff]  ;;  %s849_s16 = smov [#allocation11]  }
  0x3e   :  { %597 = vmatprep.subr.mxu1 %v847_v0  ;;  %629 = vmatprep.mubr.msk.f32.mxu1 %vm848_vm0, %v847_v0  ;;  %v111_v6 = vld [vmem:[#allocation5 + $0x58] sm:$0xff]  ;;  %v207_v7 = vld [vmem:[#allocation7 + $0x70] sm:$0xff]  ;;  %v206_v8 = vld [vmem:[#allocation7 + $0x68] sm:$0xff]  ;;  %s479_s17 = sshll.u32 %s849_s16, 4  ;;  %s480_s17 = int_to_ptr.vmem [resolvable:$true] %s479_s17 }
  0x3f   :  { %563 = vmatpush3.msra.mxu0 %v115_v1  ;;  %598 = vmatpush3.msra.mxu1 %v208_v5  ;;  %v110_v9 = vld [vmem:[#allocation5 + $0x50] sm:$0xff]  ;;  %v205_v10 = vld [vmem:[#allocation7 + $0x60] sm:$0xff]  ;;  %v109_v11 = vld [vmem:[#allocation5 + $0x48] sm:$0xff]  ;;  %s812_s18 = scalar_lea.vmem %s480_s17, 128  ;;  %p817_p12 = scmp.lt.s32.totalorder %s480_s17, %s480_s17 }
  0x40   :  { %564 = vmatprep.subr.mxu0 %v847_v0  ;;  %599 = vmatprep.subr.mxu1 %v847_v0  ;;  %v204_v12 = vld [vmem:[#allocation7 + $0x58] sm:$0xff]  ;;  %v108_v13 = vld [vmem:[#allocation5 + $0x40] sm:$0xff]  ;;  %v203_v14 = vld [vmem:[#allocation7 + $0x50] sm:$0xff]  ;;  %p813_p11 = scmp.ne.s32.totalorder %s480_s17, %s812_s18  ;;  %p818_p13 = scmp.lt.s32.totalorder %s812_s18, %s812_s18 }
  0x41   :  { %565 = vmatpush3.msra.mxu0 %v114_v2  ;;  %600 = vmatpush3.msra.mxu1 %v207_v7  ;;  %v107_v15 = vld [vmem:[#allocation5 + $0x38] sm:$0xff]  ;;  %v202_v16 = vld [vmem:[#allocation7 + $0x48] sm:$0xff]  ;;  %v106_v17 = vld [vmem:[#allocation5 + $0x30] sm:$0xff] }
  0x42   :  { %566 = vmatprep.subr.mxu0 %v847_v0  ;;  %601 = vmatprep.subr.mxu1 %v847_v0  ;;  %v201_v18 = vld [vmem:[#allocation7 + $0x40] sm:$0xff]  ;;  %v105_v19 = vld [vmem:[#allocation5 + $0x28] sm:$0xff]  ;;  %v200_v20 = vld [vmem:[#allocation7 + $0x38] sm:$0xff]  ;;  %p819_p0 = por %p818_p13, %p817_p12 }
  0x43   :  { %567 = vmatpush3.msra.mxu0 %v113_v3  ;;  %602 = vmatpush3.msra.mxu1 %v206_v8  ;;  %v104_v21 = vld [vmem:[#allocation5 + $0x20] sm:$0xff]  ;;  %v199_v22 = vld [vmem:[#allocation7 + $0x30] sm:$0xff]  ;;  %v103_v23 = vld [vmem:[#allocation5 + $0x18] sm:$0xff] }
  0x44   :  { %568 = vmatprep.subr.mxu0 %v847_v0  ;;  %603 = vmatprep.subr.mxu1 %v847_v0  ;;  %v198_v24 = vld [vmem:[#allocation7 + $0x28] sm:$0xff]  ;;  %v102_v25 = vld [vmem:[#allocation5 + $0x10] sm:$0xff]  ;;  %v197_v26 = vld [vmem:[#allocation7 + $0x20] sm:$0xff]  ;;  %p820_p1 = pnand %p819_p0, %p813_p11 }
  0x45   :  { %569 = vmatpush3.msra.mxu0 %v112_v4  ;;  %604 = vmatpush3.msra.mxu1 %v205_v10  ;;  %v101_v27 = vld [vmem:[#allocation5 + $0x8] sm:$0xff]  ;;  %v196_v28 = vld [vmem:[#allocation7 + $0x18] sm:$0xff]  ;;  %v100_v29 = vld [vmem:[#allocation5] sm:$0xff] }
  0x46   :  { %570 = vmatprep.subr.mxu0 %v847_v0  ;;  %605 = vmatprep.subr.mxu1 %v847_v0  ;;  %v99_v30 = vld [vmem:[#allocation2] sm:$0xff]  ;;  %v195_v31 = vld [vmem:[#allocation7 + $0x10] sm:$0xff]  ;;  %v194_v32 = vld [vmem:[#allocation7 + $0x8] sm:$0xff] }
  0x47   :  { %571 = vmatpush3.msra.mxu0 %v111_v6  ;;  %606 = vmatpush3.msra.mxu1 %v204_v12  ;;  %v193_v33 = vld [vmem:[#allocation7] sm:$0xff]  ;;  %v301_v34 = vld [vmem:[#allocation8 + $0x78] sm:$0xff]  ;;  %v300_v35 = vld [vmem:[#allocation8 + $0x70] sm:$0xff] }
  0x48   :  { %572 = vmatprep.subr.mxu0 %v847_v0  ;;  %607 = vmatprep.subr.mxu1 %v847_v0  ;;  %v299_v36 = vld [vmem:[#allocation8 + $0x68] sm:$0xff]  ;;  %v298_v37 = vld [vmem:[#allocation8 + $0x60] sm:$0xff]  ;;  %v297_v38 = vld [vmem:[#allocation8 + $0x58] sm:$0xff] }
  0x49   :  { %573 = vmatpush3.msra.mxu0 %v110_v9  ;;  %608 = vmatpush3.msra.mxu1 %v203_v14  ;;  %v296_v39 = vld [vmem:[#allocation8 + $0x50] sm:$0xff]  ;;  %v295_v40 = vld [vmem:[#allocation8 + $0x48] sm:$0xff]  ;;  %v294_v41 = vld [vmem:[#allocation8 + $0x40] sm:$0xff] }
  0x4a   :  { %574 = vmatprep.subr.mxu0 %v847_v0  ;;  %609 = vmatprep.subr.mxu1 %v847_v0  ;;  %v293_v42 = vld [vmem:[#allocation8 + $0x38] sm:$0xff]  ;;  %v292_v43 = vld [vmem:[#allocation8 + $0x30] sm:$0xff]  ;;  %v291_v44 = vld [vmem:[#allocation8 + $0x28] sm:$0xff] }
  0x4b   :  { %575 = vmatpush3.msra.mxu0 %v109_v11  ;;  %610 = vmatpush3.msra.mxu1 %v202_v16  ;;  %v290_v45 = vld [vmem:[#allocation8 + $0x20] sm:$0xff]  ;;  %v289_v46 = vld [vmem:[#allocation8 + $0x18] sm:$0xff]  ;;  %v288_v47 = vld [vmem:[#allocation8 + $0x10] sm:$0xff] }
  0x4c   :  { %576 = vmatprep.subr.mxu0 %v847_v0  ;;  %611 = vmatprep.subr.mxu1 %v847_v0  ;;  %v490_v48 = vld [vmem:[%s1016_s2] ss:$0 sm:$0xff]  ;;  %v287_v52 = vld [vmem:[#allocation8 + $0x8] sm:$0xff]  ;;  %v286_v53 = vld [vmem:[#allocation8] sm:$0xff] }
  0x4d   :  { %577 = vmatpush3.msra.mxu0 %v108_v13  ;;  %612 = vmatpush3.msra.mxu1 %v201_v18  ;;  %v394_v54 = vld [vmem:[#allocation10 + $0x78] sm:$0xff]  ;;  %v393_v55 = vld [vmem:[#allocation10 + $0x70] sm:$0xff]  ;;  %v392_v56 = vld [vmem:[#allocation10 + $0x68] sm:$0xff] }
  0x4e   :  { %578 = vmatprep.subr.mxu0 %v847_v0  ;;  %613 = vmatprep.subr.mxu1 %v847_v0  ;;  %v391_v57 = vld [vmem:[#allocation10 + $0x60] sm:$0xff]  ;;  %v390_v58 = vld [vmem:[#allocation10 + $0x58] sm:$0xff]  ;;  %v389_v59 = vld [vmem:[#allocation10 + $0x50] sm:$0xff] }
  0x4f   :  { %579 = vmatpush3.msra.mxu0 %v107_v15  ;;  %614 = vmatpush3.msra.mxu1 %v200_v20  ;;  %v388_v60 = vld [vmem:[#allocation10 + $0x48] sm:$0xff]  ;;  %v387_v61 = vld [vmem:[#allocation10 + $0x40] sm:$0xff]  ;;  %v386_v62 = vld [vmem:[#allocation10 + $0x38] sm:$0xff] }
  0x50   :  { %580 = vmatprep.subr.mxu0 %v847_v0  ;;  %615 = vmatprep.subr.mxu1 %v847_v0  ;;  %v385_v63 = vld [vmem:[#allocation10 + $0x30] sm:$0xff]  ;;  %v384_v1 = vld [vmem:[#allocation10 + $0x28] sm:$0xff]  ;;  %v383_v2 = vld [vmem:[#allocation10 + $0x20] sm:$0xff] }
  0x51   :  { %581 = vmatpush3.msra.mxu0 %v106_v17  ;;  %616 = vmatpush3.msra.mxu1 %v199_v22  ;;  %v382_v3 = vld [vmem:[#allocation10 + $0x18] sm:$0xff]  ;;  %v381_v4 = vld [vmem:[#allocation10 + $0x10] sm:$0xff]  ;;  %v380_v9 = vld [vmem:[#allocation10 + $0x8] sm:$0xff] }
  0x52   :  { %582 = vmatprep.subr.mxu0 %v847_v0  ;;  %617 = vmatprep.subr.mxu1 %v847_v0  ;;  %v491_v5 = vld [vmem:[%s1018_s4] ss:$0 sm:$0xff]  ;;  %v379_v10 = vld [vmem:[#allocation10] sm:$0xff] }
  0x53   :  { %583 = vmatpush3.msra.mxu0 %v105_v19  ;;  %618 = vmatpush3.msra.mxu1 %v198_v24  ;;  %v492_v11 = vld [vmem:[%s1020_s6] ss:$0 sm:$0xff] }
  0x54   :  { %584 = vmatprep.subr.mxu0 %v847_v0  ;;  %619 = vmatprep.subr.mxu1 %v847_v0  ;;  %v493_v15 = vld [vmem:[%s1022_s8] ss:$0 sm:$0xff] }
  0x55   :  { %585 = vmatpush3.msra.mxu0 %v104_v21  ;;  %620 = vmatpush3.msra.mxu1 %v197_v26 }
  0x56   :  { %586 = vmatprep.subr.mxu0 %v847_v0  ;;  %621 = vmatprep.subr.mxu1 %v847_v0 }
  0x57   :  { %587 = vmatpush3.msra.mxu0 %v103_v23  ;;  %622 = vmatpush3.msra.mxu1 %v196_v28 }
  0x58   :  { %588 = vmatprep.subr.mxu0 %v847_v0  ;;  %623 = vmatprep.subr.mxu1 %v847_v0 }
  0x59   :  { %589 = vmatpush3.msra.mxu0 %v102_v25  ;;  %624 = vmatpush3.msra.mxu1 %v195_v31 }
  0x5a   :  { %590 = vmatprep.subr.mxu0 %v847_v0  ;;  %625 = vmatprep.subr.mxu1 %v847_v0 }
  0x5b   :  { %591 = vmatpush3.msra.mxu0 %v101_v27  ;;  %626 = vmatpush3.msra.mxu1 %v194_v32 }
  0x5c   :  { %592 = vmatprep.subr.mxu0 %v847_v0  ;;  %627 = vmatprep.subr.mxu1 %v847_v0 }
  0x5d   :  { %593 = vmatpush3.msra.mxu0 %v100_v29  ;;  %628 = vmatpush3.msra.mxu1 %v193_v33 }
  0x5e   :  { %595 = vmatmul.mubr.f32.vlgmr.msra.gmra.mxu0 %v99_v30  ;;  %632 = vmatprep.subr.mxu0 %v847_v0 }
  0x5f   :  { %664 = vmatprep.mubr.msk.f32.mxu0 %vm848_vm0, %v847_v0  ;;  %667 = vmatprep.subr.mxu1 %v847_v0 }
  0x60   :  { %633 = vmatpush3.msra.mxu0 %v301_v34 }
  0x61   :  { %634 = vmatprep.subr.mxu0 %v847_v0 }
  0x62   :  { %635 = vmatpush3.msra.mxu0 %v300_v35 }
  0x63   :  { %636 = vmatprep.subr.mxu0 %v847_v0 }
  0x64   :  { %637 = vmatpush3.msra.mxu0 %v299_v36 }
  0x65   :  { %638 = vmatprep.subr.mxu0 %v847_v0 }
  0x66   :  { %639 = vmatpush3.msra.mxu0 %v298_v37 }
  0x67   :  { %640 = vmatprep.subr.mxu0 %v847_v0 }
  0x68   :  { %641 = vmatpush3.msra.mxu0 %v297_v38 }
  0x69   :  { %642 = vmatprep.subr.mxu0 %v847_v0 }
  0x6a   :  { %643 = vmatpush3.msra.mxu0 %v296_v39 }
  0x6b   :  { %644 = vmatprep.subr.mxu0 %v847_v0 }
  0x6c   :  { %645 = vmatpush3.msra.mxu0 %v295_v40 }
  0x6d   :  { %646 = vmatprep.subr.mxu0 %v847_v0 }
  0x6e   :  { %647 = vmatpush3.msra.mxu0 %v294_v41 }
  0x6f   :  { %648 = vmatprep.subr.mxu0 %v847_v0 }
  0x70   :  { %649 = vmatpush3.msra.mxu0 %v293_v42 }
  0x71   :  { %650 = vmatprep.subr.mxu0 %v847_v0 }
  0x72   :  { %651 = vmatpush3.msra.mxu0 %v292_v43 }
  0x73   :  { %652 = vmatprep.subr.mxu0 %v847_v0 }
  0x74   :  { %653 = vmatpush3.msra.mxu0 %v291_v44 }
  0x75   :  { %654 = vmatprep.subr.mxu0 %v847_v0 }
  0x76   :  { %655 = vmatpush3.msra.mxu0 %v290_v45 }
  0x77   :  { %656 = vmatprep.subr.mxu0 %v847_v0 }
  0x78   :  { %657 = vmatpush3.msra.mxu0 %v289_v46 }
  0x79   :  { %658 = vmatprep.subr.mxu0 %v847_v0 }
  0x7a   :  { %659 = vmatpush3.msra.mxu0 %v288_v47 }
  0x7b   :  { %660 = vmatprep.subr.mxu0 %v847_v0 }
  0x7c   :  { %661 = vmatpush3.msra.mxu0 %v287_v52 }
  0x7d   :  { %662 = vmatprep.subr.mxu0 %v847_v0 }
  0x7e   :  { %663 = vmatpush3.msra.mxu0 %v286_v53 }
 0x11e   :  { %v189_v49 = vpop.f32.mrf.mxu0 }
 0x11f   :  { %v190_v50 = vadd.f32 %v490_v48, %v189_v49 }
 0x120   :  { %v596_v51 = vpop.f32.mrf.mxu0 }
 0x121   :  { %630 = vmatmul.mubr.f32.vlgmr.msra.gmra.mxu1 %v190_v50 }
 0x122   :  { %699 = vmatprep.mubr.msk.f32.mxu1 %vm848_vm0, %v847_v0  ;;  %668 = vmatpush3.msra.mxu1 %v394_v54 }
 0x123   :  { %669 = vmatprep.subr.mxu1 %v847_v0 }
 0x124   :  { %670 = vmatpush3.msra.mxu1 %v393_v55 }
 0x125   :  { %671 = vmatprep.subr.mxu1 %v847_v0 }
 0x126   :  { %672 = vmatpush3.msra.mxu1 %v392_v56 }
 0x127   :  { %673 = vmatprep.subr.mxu1 %v847_v0 }
 0x128   :  { %674 = vmatpush3.msra.mxu1 %v391_v57 }
 0x129   :  { %675 = vmatprep.subr.mxu1 %v847_v0 }
 0x12a   :  { %676 = vmatpush3.msra.mxu1 %v390_v58 }
 0x12b   :  { %677 = vmatprep.subr.mxu1 %v847_v0 }
 0x12c   :  { %678 = vmatpush3.msra.mxu1 %v389_v59 }
 0x12d   :  { %679 = vmatprep.subr.mxu1 %v847_v0 }
 0x12e   :  { %680 = vmatpush3.msra.mxu1 %v388_v60 }
 0x12f   :  { %681 = vmatprep.subr.mxu1 %v847_v0 }
 0x130   :  { %682 = vmatpush3.msra.mxu1 %v387_v61 }
 0x131   :  { %683 = vmatprep.subr.mxu1 %v847_v0 }
 0x132   :  { %684 = vmatpush3.msra.mxu1 %v386_v62 }
 0x133   :  { %685 = vmatprep.subr.mxu1 %v847_v0 }
 0x134   :  { %686 = vmatpush3.msra.mxu1 %v385_v63 }
 0x135   :  { %687 = vmatprep.subr.mxu1 %v847_v0 }
 0x136   :  { %688 = vmatpush3.msra.mxu1 %v384_v1 }
 0x137   :  { %689 = vmatprep.subr.mxu1 %v847_v0 }
 0x138   :  { %690 = vmatpush3.msra.mxu1 %v383_v2 }
 0x139   :  { %691 = vmatprep.subr.mxu1 %v847_v0 }
 0x13a   :  { %692 = vmatpush3.msra.mxu1 %v382_v3 }
 0x13b   :  { %693 = vmatprep.subr.mxu1 %v847_v0 }
 0x13c   :  { %694 = vmatpush3.msra.mxu1 %v381_v4 }
 0x13d   :  { %695 = vmatprep.subr.mxu1 %v847_v0 }
 0x13e   :  { %696 = vmatpush3.msra.mxu1 %v380_v9 }
 0x13f   :  { %697 = vmatprep.subr.mxu1 %v847_v0 }
 0x140   :  { %698 = vmatpush3.msra.mxu1 %v379_v10 }
 0x1e1   :  { %v282_v6 = vpop.f32.mrf.mxu1 }
 0x1e2   :  { %v283_v7 = vadd.f32 %v491_v5, %v282_v6 }
 0x1e3   :  { %v631_v8 = vpop.f32.mrf.mxu1 }
 0x1e4   :  { %665 = vmatmul.mubr.f32.vlgmr.msra.gmra.mxu0 %v283_v7 }
 0x2a4   :  { %v375_v12 = vpop.f32.mrf.mxu0 }
 0x2a5   :  { %v376_v13 = vadd.f32 %v492_v11, %v375_v12 }
 0x2a6   :  { %v666_v14 = vpop.f32.mrf.mxu0 }
 0x2a7   :  { %700 = vmatmul.mubr.f32.vlgmr.msra.gmra.mxu1 %v376_v13 }
 0x367   :  { %v468_v16 = vpop.f32.mrf.mxu1 }
 0x368   :  { %v469_v17 = vadd.f32 %v493_v15, %v468_v16 }
 0x369   :  { %v701_v0 = vpop.f32.mrf.mxu1 }
 0x36a   :  { %472 = vst [vmem:[#allocation11] sm:$0xff] %v469_v17 }
 0x36b   :  { %823 = shalt.err (!%p820_p1)
}
 0x36c   :  { %482 = dma.vmem_to_hbm [thread:$0]  %s480_s17, 128, %s1023_s9, [#allocation4]  }
 0x36d   :  { %838 = dma.done.wait [#allocation4], 128  }
 0x36e   :  { %839 = vsyncadd [#allocation4], 4294967168 }
 0x36f   :  { %486 = vsyncpa [#allocation3], 1 }
 0x370   :  { %487 = vsyncpa [#allocation6], 1 }
 0x371   :  { %488 = vsyncpa [#allocation9], 1 }
 0x372   :  { %489 = vsyncpa [#allocation4], 1 }

// kernel: tpu_custom_call.1
= control target key start
LH: loop header
LB: loop body
LE: loop exit
PB: predicated region body
PF: predicated region fallthrough
CT: control target
= control target key end

     0   :  { %14 = vsyncpa [#allocation3], 0  ;;  %s1014_s0 = inlined_call_operand.hbm [shape: f32[8,128], index: 0, kind: input, shape index: {}]   ;;  %s1015_s1 = inlined_call_operand.hbm [shape: f32[128,128], index: 1, kind: input, shape index: {}]   ;;  %s1016_s2 = inlined_call_operand.vmem [shape: f32[1,128], index: 2, kind: input, shape index: {}]   ;;  %s1017_s3 = inlined_call_operand.hbm [shape: f32[128,128], index: 3, kind: input, shape index: {}]   ;;  %s1018_s4 = inlined_call_operand.vmem [shape: f32[1,128], index: 4, kind: input, shape index: {}]   ;;  %s1019_s5 = inlined_call_operand.hbm [shape: f32[128,128], index: 5, kind: input, shape index: {}]   ;;  %s1020_s6 = inlined_call_operand.vmem [shape: f32[1,128], index: 6, kind: input, shape index: {}]   ;;  %s1021_s7 = inlined_call_operand.hbm [shape: f32[128,128], index: 7, kind: input, shape index: {}]   ;;  %s1022_s8 = inlined_call_operand.vmem [shape: f32[1,128], index: 8, kind: input, shape index: {}]   ;;  %s1023_s9 = inlined_call_operand.hbm [shape: f32[8,128], index: 9, kind: output, shape index: {}]  }
   0x1   :  { %15 = vsyncpa [#allocation6], 0 }
   0x2   :  { %16 = vsyncpa [#allocation9], 0 }
   0x3   :  { %17 = vsyncpa [#allocation4], 0  ;;  %s840_s30 = smov [#allocation5]  }
   0x4   :  { %s33_s10 = sshll.u32 %s840_s30, 4  ;;  %s34_s10 = int_to_ptr.vmem [resolvable:$true] %s33_s10 }
   0x5   :  { %s720_s11 = scalar_lea.vmem %s34_s10, 2048  ;;  %p725_p1 = scmp.lt.s32.totalorder %s34_s10, %s34_s10 }
   0x6   :  { %p721_p0 = scmp.ne.s32.totalorder %s34_s10, %s720_s11  ;;  %p726_p2 = scmp.lt.s32.totalorder %s720_s11, %s720_s11 }
   0x8   :  { %p727_p3 = por %p726_p2, %p725_p1 }
   0xa   :  { %p728_p4 = pnand %p727_p3, %p721_p0 }
   0xc   :  { %731 = shalt.err (!%p728_p4)
}
   0xd   :  { %s841_s12 = smov 128   ;;  %s842_s13 = smov 8  }
   0xe   :  { %39 = dma.hbm_to_vmem [thread:$0]  %s1015_s1, 2048, %s34_s10, [#allocation6], %s841_s12, %s841_s12, %s842_s13  }
   0xf   :  { %s843_s16 = smov [#allocation8]   ;;  %s844_s18 = smov [#allocation2]  }
  0x10   :  { %s61_s17 = sshll.u32 %s843_s16, 4  ;;  %s24_s19 = sshll.u32 %s844_s18, 4  ;;  %s62_s17 = int_to_ptr.vmem [resolvable:$true] %s61_s17  ;;  %s25_s19 = int_to_ptr.vmem [resolvable:$true] %s24_s19 }
  0x11   :  { %s740_s20 = scalar_lea.vmem %s62_s17, 2048  ;;  %p745_p6 = scmp.lt.s32.totalorder %s62_s17, %s62_s17 }
  0x12   :  { %p741_p5 = scmp.ne.s32.totalorder %s62_s17, %s740_s20  ;;  %p746_p7 = scmp.lt.s32.totalorder %s740_s20, %s740_s20 }
  0x14   :  { %p747_p8 = por %p746_p7, %p745_p6 }
  0x16   :  { %p748_p9 = pnand %p747_p8, %p741_p5 }
  0x18   :  { %751 = shalt.err (!%p748_p9)
}
  0x19   :  { %67 = dma.hbm_to_vmem [thread:$0]  %s1019_s5, 2048, %s62_s17, [#allocation9], %s841_s12, %s841_s12, %s842_s13  }
  0x1a   :  { %s760_s1 = scalar_lea.vmem %s25_s19, 128  ;;  %p765_p11 = scmp.lt.s32.totalorder %s25_s19, %s25_s19 }
  0x1b   :  { %p761_p10 = scmp.ne.s32.totalorder %s25_s19, %s760_s1  ;;  %p766_p12 = scmp.lt.s32.totalorder %s760_s1, %s760_s1 }
  0x1d   :  { %p767_p13 = por %p766_p12, %p765_p11 }
  0x1f   :  { %p768_p0 = pnand %p767_p13, %p761_p10 }
  0x21   :  { %771 = shalt.err (!%p768_p0)
}
  0x22   :  { %27 = dma.hbm_to_vmem [thread:$0]  %s1014_s0, 128, %s25_s19, [#allocation3]  }
  0x23   :  { %s845_s25 = smov [#allocation7]   ;;  %s846_s27 = smov [#allocation10]  }
  0x24   :  { %s47_s26 = sshll.u32 %s845_s25, 4  ;;  %s75_s28 = sshll.u32 %s846_s27, 4  ;;  %s48_s26 = int_to_ptr.vmem [resolvable:$true] %s47_s26  ;;  %s76_s28 = int_to_ptr.vmem [resolvable:$true] %s75_s28 }
  0x25   :  { %s780_s29 = scalar_lea.vmem %s48_s26, 2048  ;;  %p785_p2 = scmp.lt.s32.totalorder %s48_s26, %s48_s26 }
  0x26   :  { %p781_p1 = scmp.ne.s32.totalorder %s48_s26, %s780_s29  ;;  %p786_p3 = scmp.lt.s32.totalorder %s780_s29, %s780_s29 }
  0x28   :  { %p787_p4 = por %p786_p3, %p785_p2 }
  0x2a   :  { %p788_p5 = pnand %p787_p4, %p781_p1 }
  0x2c   :  { %791 = shalt.err (!%p788_p5)
}
  0x2d   :  { %53 = dma.hbm_to_vmem [thread:$0]  %s1017_s3, 2048, %s48_s26, [#allocation6], %s841_s12, %s841_s12, %s842_s13  }
  0x2e   :  { %s800_s0 = scalar_lea.vmem %s76_s28, 2048  ;;  %p805_p7 = scmp.lt.s32.totalorder %s76_s28, %s76_s28 }
  0x2f   :  { %p801_p6 = scmp.ne.s32.totalorder %s76_s28, %s800_s0  ;;  %p806_p8 = scmp.lt.s32.totalorder %s800_s0, %s800_s0 }
  0x31   :  { %p807_p9 = por %p806_p8, %p805_p7 }
  0x33   :  { %p808_p10 = pnand %p807_p9, %p801_p6 }
  0x35   :  { %811 = shalt.err (!%p808_p10)
}
  0x36   :  { %81 = dma.hbm_to_vmem [thread:$0]  %s1021_s7, 2048, %s76_s28, [#allocation9], %s841_s12, %s841_s12, %s842_s13  }
  0x37   :  { %832 = dma.done.wait [#allocation3], 128  }
  0x38   :  { %833 = vsyncadd [#allocation3], 4294967168 }
  0x39   :  { %834 = dma.done.wait [#allocation6], 4096  }
  0x3a   :  { %835 = vsyncadd [#allocation6], 4294963200 }
  0x3b   :  { %836 = dma.done.wait [#allocation9], 4096  }
  0x3c   :  { %837 = vsyncadd [#allocation9], 4294963200  ;;  %v847_v0 = vmov 0.0   ;;  %vm848_vm0 = vmmov 0   ;;  %v115_v1 = vld [vmem:[#allocation5 + $0x78] sm:$0xff]  ;;  %v114_v2 = vld [vmem:[#allocation5 + $0x70] sm:$0xff] }
  0x3d   :  { %562 = vmatprep.subr.mxu0 %v847_v0  ;;  %594 = vmatprep.mubr.msk.f32.mxu0 %vm848_vm0, %v847_v0  ;;  %v113_v3 = vld [vmem:[#allocation5 + $0x68] sm:$0xff]  ;;  %v112_v4 = vld [vmem:[#allocation5 + $0x60] sm:$0xff]  ;;  %v208_v5 = vld [vmem:[#allocation7 + $0x78] sm:$0xff]  ;;  %s849_s16 = smov [#allocation11]  }
  0x3e   :  { %597 = vmatprep.subr.mxu1 %v847_v0  ;;  %629 = vmatprep.mubr.msk.f32.mxu1 %vm848_vm0, %v847_v0  ;;  %v111_v6 = vld [vmem:[#allocation5 + $0x58] sm:$0xff]  ;;  %v207_v7 = vld [vmem:[#allocation7 + $0x70] sm:$0xff]  ;;  %v206_v8 = vld [vmem:[#allocation7 + $0x68] sm:$0xff]  ;;  %s479_s17 = sshll.u32 %s849_s16, 4  ;;  %s480_s17 = int_to_ptr.vmem [resolvable:$true] %s479_s17 }
  0x3f   :  { %563 = vmatpush3.msra.mxu0 %v115_v1  ;;  %598 = vmatpush3.msra.mxu1 %v208_v5  ;;  %v110_v9 = vld [vmem:[#allocation5 + $0x50] sm:$0xff]  ;;  %v205_v10 = vld [vmem:[#allocation7 + $0x60] sm:$0xff]  ;;  %v109_v11 = vld [vmem:[#allocation5 + $0x48] sm:$0xff]  ;;  %s812_s18 = scalar_lea.vmem %s480_s17, 128  ;;  %p817_p12 = scmp.lt.s32.totalorder %s480_s17, %s480_s17 }
  0x40   :  { %564 = vmatprep.subr.mxu0 %v847_v0  ;;  %599 = vmatprep.subr.mxu1 %v847_v0  ;;  %v204_v12 = vld [vmem:[#allocation7 + $0x58] sm:$0xff]  ;;  %v108_v13 = vld [vmem:[#allocation5 + $0x40] sm:$0xff]  ;;  %v203_v14 = vld [vmem:[#allocation7 + $0x50] sm:$0xff]  ;;  %p813_p11 = scmp.ne.s32.totalorder %s480_s17, %s812_s18  ;;  %p818_p13 = scmp.lt.s32.totalorder %s812_s18, %s812_s18 }
  0x41   :  { %565 = vmatpush3.msra.mxu0 %v114_v2  ;;  %600 = vmatpush3.msra.mxu1 %v207_v7  ;;  %v107_v15 = vld [vmem:[#allocation5 + $0x38] sm:$0xff]  ;;  %v202_v16 = vld [vmem:[#allocation7 + $0x48] sm:$0xff]  ;;  %v106_v17 = vld [vmem:[#allocation5 + $0x30] sm:$0xff] }
  0x42   :  { %566 = vmatprep.subr.mxu0 %v847_v0  ;;  %601 = vmatprep.subr.mxu1 %v847_v0  ;;  %v201_v18 = vld [vmem:[#allocation7 + $0x40] sm:$0xff]  ;;  %v105_v19 = vld [vmem:[#allocation5 + $0x28] sm:$0xff]  ;;  %v200_v20 = vld [vmem:[#allocation7 + $0x38] sm:$0xff]  ;;  %p819_p0 = por %p818_p13, %p817_p12 }
  0x43   :  { %567 = vmatpush3.msra.mxu0 %v113_v3  ;;  %602 = vmatpush3.msra.mxu1 %v206_v8  ;;  %v104_v21 = vld [vmem:[#allocation5 + $0x20] sm:$0xff]  ;;  %v199_v22 = vld [vmem:[#allocation7 + $0x30] sm:$0xff]  ;;  %v103_v23 = vld [vmem:[#allocation5 + $0x18] sm:$0xff] }
  0x44   :  { %568 = vmatprep.subr.mxu0 %v847_v0  ;;  %603 = vmatprep.subr.mxu1 %v847_v0  ;;  %v198_v24 = vld [vmem:[#allocation7 + $0x28] sm:$0xff]  ;;  %v102_v25 = vld [vmem:[#allocation5 + $0x10] sm:$0xff]  ;;  %v197_v26 = vld [vmem:[#allocation7 + $0x20] sm:$0xff]  ;;  %p820_p1 = pnand %p819_p0, %p813_p11 }
  0x45   :  { %569 = vmatpush3.msra.mxu0 %v112_v4  ;;  %604 = vmatpush3.msra.mxu1 %v205_v10  ;;  %v101_v27 = vld [vmem:[#allocation5 + $0x8] sm:$0xff]  ;;  %v196_v28 = vld [vmem:[#allocation7 + $0x18] sm:$0xff]  ;;  %v100_v29 = vld [vmem:[#allocation5] sm:$0xff] }
  0x46   :  { %570 = vmatprep.subr.mxu0 %v847_v0  ;;  %605 = vmatprep.subr.mxu1 %v847_v0  ;;  %v99_v30 = vld [vmem:[#allocation2] sm:$0xff]  ;;  %v195_v31 = vld [vmem:[#allocation7 + $0x10] sm:$0xff]  ;;  %v194_v32 = vld [vmem:[#allocation7 + $0x8] sm:$0xff] }
  0x47   :  { %571 = vmatpush3.msra.mxu0 %v111_v6  ;;  %606 = vmatpush3.msra.mxu1 %v204_v12  ;;  %v193_v33 = vld [vmem:[#allocation7] sm:$0xff]  ;;  %v301_v34 = vld [vmem:[#allocation8 + $0x78] sm:$0xff]  ;;  %v300_v35 = vld [vmem:[#allocation8 + $0x70] sm:$0xff] }
  0x48   :  { %572 = vmatprep.subr.mxu0 %v847_v0  ;;  %607 = vmatprep.subr.mxu1 %v847_v0  ;;  %v299_v36 = vld [vmem:[#allocation8 + $0x68] sm:$0xff]  ;;  %v298_v37 = vld [vmem:[#allocation8 + $0x60] sm:$0xff]  ;;  %v297_v38 = vld [vmem:[#allocation8 + $0x58] sm:$0xff] }
  0x49   :  { %573 = vmatpush3.msra.mxu0 %v110_v9  ;;  %608 = vmatpush3.msra.mxu1 %v203_v14  ;;  %v296_v39 = vld [vmem:[#allocation8 + $0x50] sm:$0xff]  ;;  %v295_v40 = vld [vmem:[#allocation8 + $0x48] sm:$0xff]  ;;  %v294_v41 = vld [vmem:[#allocation8 + $0x40] sm:$0xff] }
  0x4a   :  { %574 = vmatprep.subr.mxu0 %v847_v0  ;;  %609 = vmatprep.subr.mxu1 %v847_v0  ;;  %v293_v42 = vld [vmem:[#allocation8 + $0x38] sm:$0xff]  ;;  %v292_v43 = vld [vmem:[#allocation8 + $0x30] sm:$0xff]  ;;  %v291_v44 = vld [vmem:[#allocation8 + $0x28] sm:$0xff] }
  0x4b   :  { %575 = vmatpush3.msra.mxu0 %v109_v11  ;;  %610 = vmatpush3.msra.mxu1 %v202_v16  ;;  %v290_v45 = vld [vmem:[#allocation8 + $0x20] sm:$0xff]  ;;  %v289_v46 = vld [vmem:[#allocation8 + $0x18] sm:$0xff]  ;;  %v288_v47 = vld [vmem:[#allocation8 + $0x10] sm:$0xff] }
  0x4c   :  { %576 = vmatprep.subr.mxu0 %v847_v0  ;;  %611 = vmatprep.subr.mxu1 %v847_v0  ;;  %v490_v48 = vld [vmem:[%s1016_s2] ss:$0 sm:$0xff]  ;;  %v287_v52 = vld [vmem:[#allocation8 + $0x8] sm:$0xff]  ;;  %v286_v53 = vld [vmem:[#allocation8] sm:$0xff] }
  0x4d   :  { %577 = vmatpush3.msra.mxu0 %v108_v13  ;;  %612 = vmatpush3.msra.mxu1 %v201_v18  ;;  %v394_v54 = vld [vmem:[#allocation10 + $0x78] sm:$0xff]  ;;  %v393_v55 = vld [vmem:[#allocation10 + $0x70] sm:$0xff]  ;;  %v392_v56 = vld [vmem:[#allocation10 + $0x68] sm:$0xff] }
  0x4e   :  { %578 = vmatprep.subr.mxu0 %v847_v0  ;;  %613 = vmatprep.subr.mxu1 %v847_v0  ;;  %v391_v57 = vld [vmem:[#allocation10 + $0x60] sm:$0xff]  ;;  %v390_v58 = vld [vmem:[#allocation10 + $0x58] sm:$0xff]  ;;  %v389_v59 = vld [vmem:[#allocation10 + $0x50] sm:$0xff] }
  0x4f   :  { %579 = vmatpush3.msra.mxu0 %v107_v15  ;;  %614 = vmatpush3.msra.mxu1 %v200_v20  ;;  %v388_v60 = vld [vmem:[#allocation10 + $0x48] sm:$0xff]  ;;  %v387_v61 = vld [vmem:[#allocation10 + $0x40] sm:$0xff]  ;;  %v386_v62 = vld [vmem:[#allocation10 + $0x38] sm:$0xff] }
  0x50   :  { %580 = vmatprep.subr.mxu0 %v847_v0  ;;  %615 = vmatprep.subr.mxu1 %v847_v0  ;;  %v385_v63 = vld [vmem:[#allocation10 + $0x30] sm:$0xff]  ;;  %v384_v1 = vld [vmem:[#allocation10 + $0x28] sm:$0xff]  ;;  %v383_v2 = vld [vmem:[#allocation10 + $0x20] sm:$0xff] }
  0x51   :  { %581 = vmatpush3.msra.mxu0 %v106_v17  ;;  %616 = vmatpush3.msra.mxu1 %v199_v22  ;;  %v382_v3 = vld [vmem:[#allocation10 + $0x18] sm:$0xff]  ;;  %v381_v4 = vld [vmem:[#allocation10 + $0x10] sm:$0xff]  ;;  %v380_v9 = vld [vmem:[#allocation10 + $0x8] sm:$0xff] }
  0x52   :  { %582 = vmatprep.subr.mxu0 %v847_v0  ;;  %617 = vmatprep.subr.mxu1 %v847_v0  ;;  %v491_v5 = vld [vmem:[%s1018_s4] ss:$0 sm:$0xff]  ;;  %v379_v10 = vld [vmem:[#allocation10] sm:$0xff] }
  0x53   :  { %583 = vmatpush3.msra.mxu0 %v105_v19  ;;  %618 = vmatpush3.msra.mxu1 %v198_v24  ;;  %v492_v11 = vld [vmem:[%s1020_s6] ss:$0 sm:$0xff] }
  0x54   :  { %584 = vmatprep.subr.mxu0 %v847_v0  ;;  %619 = vmatprep.subr.mxu1 %v847_v0  ;;  %v493_v15 = vld [vmem:[%s1022_s8] ss:$0 sm:$0xff] }
  0x55   :  { %585 = vmatpush3.msra.mxu0 %v104_v21  ;;  %620 = vmatpush3.msra.mxu1 %v197_v26 }
  0x56   :  { %586 = vmatprep.subr.mxu0 %v847_v0  ;;  %621 = vmatprep.subr.mxu1 %v847_v0 }
  0x57   :  { %587 = vmatpush3.msra.mxu0 %v103_v23  ;;  %622 = vmatpush3.msra.mxu1 %v196_v28 }
  0x58   :  { %588 = vmatprep.subr.mxu0 %v847_v0  ;;  %623 = vmatprep.subr.mxu1 %v847_v0 }
  0x59   :  { %589 = vmatpush3.msra.mxu0 %v102_v25  ;;  %624 = vmatpush3.msra.mxu1 %v195_v31 }
  0x5a   :  { %590 = vmatprep.subr.mxu0 %v847_v0  ;;  %625 = vmatprep.subr.mxu1 %v847_v0 }
  0x5b   :  { %591 = vmatpush3.msra.mxu0 %v101_v27  ;;  %626 = vmatpush3.msra.mxu1 %v194_v32 }
  0x5c   :  { %592 = vmatprep.subr.mxu0 %v847_v0  ;;  %627 = vmatprep.subr.mxu1 %v847_v0 }
  0x5d   :  { %593 = vmatpush3.msra.mxu0 %v100_v29  ;;  %628 = vmatpush3.msra.mxu1 %v193_v33 }
  0x5e   :  { %595 = vmatmul.mubr.f32.vlgmr.msra.gmra.mxu0 %v99_v30  ;;  %632 = vmatprep.subr.mxu0 %v847_v0 }
  0x5f   :  { %664 = vmatprep.mubr.msk.f32.mxu0 %vm848_vm0, %v847_v0  ;;  %667 = vmatprep.subr.mxu1 %v847_v0 }
  0x60   :  { %633 = vmatpush3.msra.mxu0 %v301_v34 }
  0x61   :  { %634 = vmatprep.subr.mxu0 %v847_v0 }
  0x62   :  { %635 = vmatpush3.msra.mxu0 %v300_v35 }
  0x63   :  { %636 = vmatprep.subr.mxu0 %v847_v0 }
  0x64   :  { %637 = vmatpush3.msra.mxu0 %v299_v36 }
  0x65   :  { %638 = vmatprep.subr.mxu0 %v847_v0 }
  0x66   :  { %639 = vmatpush3.msra.mxu0 %v298_v37 }
  0x67   :  { %640 = vmatprep.subr.mxu0 %v847_v0 }
  0x68   :  { %641 = vmatpush3.msra.mxu0 %v297_v38 }
  0x69   :  { %642 = vmatprep.subr.mxu0 %v847_v0 }
  0x6a   :  { %643 = vmatpush3.msra.mxu0 %v296_v39 }
  0x6b   :  { %644 = vmatprep.subr.mxu0 %v847_v0 }
  0x6c   :  { %645 = vmatpush3.msra.mxu0 %v295_v40 }
  0x6d   :  { %646 = vmatprep.subr.mxu0 %v847_v0 }
  0x6e   :  { %647 = vmatpush3.msra.mxu0 %v294_v41 }
  0x6f   :  { %648 = vmatprep.subr.mxu0 %v847_v0 }
  0x70   :  { %649 = vmatpush3.msra.mxu0 %v293_v42 }
  0x71   :  { %650 = vmatprep.subr.mxu0 %v847_v0 }
  0x72   :  { %651 = vmatpush3.msra.mxu0 %v292_v43 }
  0x73   :  { %652 = vmatprep.subr.mxu0 %v847_v0 }
  0x74   :  { %653 = vmatpush3.msra.mxu0 %v291_v44 }
  0x75   :  { %654 = vmatprep.subr.mxu0 %v847_v0 }
  0x76   :  { %655 = vmatpush3.msra.mxu0 %v290_v45 }
  0x77   :  { %656 = vmatprep.subr.mxu0 %v847_v0 }
  0x78   :  { %657 = vmatpush3.msra.mxu0 %v289_v46 }
  0x79   :  { %658 = vmatprep.subr.mxu0 %v847_v0 }
  0x7a   :  { %659 = vmatpush3.msra.mxu0 %v288_v47 }
  0x7b   :  { %660 = vmatprep.subr.mxu0 %v847_v0 }
  0x7c   :  { %661 = vmatpush3.msra.mxu0 %v287_v52 }
  0x7d   :  { %662 = vmatprep.subr.mxu0 %v847_v0 }
  0x7e   :  { %663 = vmatpush3.msra.mxu0 %v286_v53 }
 0x11e   :  { %v189_v49 = vpop.f32.mrf.mxu0 }
 0x11f   :  { %v190_v50 = vadd.f32 %v490_v48, %v189_v49 }
 0x120   :  { %v596_v51 = vpop.f32.mrf.mxu0 }
 0x121   :  { %630 = vmatmul.mubr.f32.vlgmr.msra.gmra.mxu1 %v190_v50 }
 0x122   :  { %699 = vmatprep.mubr.msk.f32.mxu1 %vm848_vm0, %v847_v0  ;;  %668 = vmatpush3.msra.mxu1 %v394_v54 }
 0x123   :  { %669 = vmatprep.subr.mxu1 %v847_v0 }
 0x124   :  { %670 = vmatpush3.msra.mxu1 %v393_v55 }
 0x125   :  { %671 = vmatprep.subr.mxu1 %v847_v0 }
 0x126   :  { %672 = vmatpush3.msra.mxu1 %v392_v56 }
 0x127   :  { %673 = vmatprep.subr.mxu1 %v847_v0 }
 0x128   :  { %674 = vmatpush3.msra.mxu1 %v391_v57 }
 0x129   :  { %675 = vmatprep.subr.mxu1 %v847_v0 }
 0x12a   :  { %676 = vmatpush3.msra.mxu1 %v390_v58 }
 0x12b   :  { %677 = vmatprep.subr.mxu1 %v847_v0 }
 0x12c   :  { %678 = vmatpush3.msra.mxu1 %v389_v59 }
 0x12d   :  { %679 = vmatprep.subr.mxu1 %v847_v0 }
 0x12e   :  { %680 = vmatpush3.msra.mxu1 %v388_v60 }
 0x12f   :  { %681 = vmatprep.subr.mxu1 %v847_v0 }
 0x130   :  { %682 = vmatpush3.msra.mxu1 %v387_v61 }
 0x131   :  { %683 = vmatprep.subr.mxu1 %v847_v0 }
 0x132   :  { %684 = vmatpush3.msra.mxu1 %v386_v62 }
 0x133   :  { %685 = vmatprep.subr.mxu1 %v847_v0 }
 0x134   :  { %686 = vmatpush3.msra.mxu1 %v385_v63 }
 0x135   :  { %687 = vmatprep.subr.mxu1 %v847_v0 }
 0x136   :  { %688 = vmatpush3.msra.mxu1 %v384_v1 }
 0x137   :  { %689 = vmatprep.subr.mxu1 %v847_v0 }
 0x138   :  { %690 = vmatpush3.msra.mxu1 %v383_v2 }
 0x139   :  { %691 = vmatprep.subr.mxu1 %v847_v0 }
 0x13a   :  { %692 = vmatpush3.msra.mxu1 %v382_v3 }
 0x13b   :  { %693 = vmatprep.subr.mxu1 %v847_v0 }
 0x13c   :  { %694 = vmatpush3.msra.mxu1 %v381_v4 }
 0x13d   :  { %695 = vmatprep.subr.mxu1 %v847_v0 }
 0x13e   :  { %696 = vmatpush3.msra.mxu1 %v380_v9 }
 0x13f   :  { %697 = vmatprep.subr.mxu1 %v847_v0 }
 0x140   :  { %698 = vmatpush3.msra.mxu1 %v379_v10 }
 0x1e1   :  { %v282_v6 = vpop.f32.mrf.mxu1 }
 0x1e2   :  { %v283_v7 = vadd.f32 %v491_v5, %v282_v6 }
 0x1e3   :  { %v631_v8 = vpop.f32.mrf.mxu1 }
 0x1e4   :  { %665 = vmatmul.mubr.f32.vlgmr.msra.gmra.mxu0 %v283_v7 }
 0x2a4   :  { %v375_v12 = vpop.f32.mrf.mxu0 }
 0x2a5   :  { %v376_v13 = vadd.f32 %v492_v11, %v375_v12 }
 0x2a6   :  { %v666_v14 = vpop.f32.mrf.mxu0 }
 0x2a7   :  { %700 = vmatmul.mubr.f32.vlgmr.msra.gmra.mxu1 %v376_v13 }
 0x367   :  { %v468_v16 = vpop.f32.mrf.mxu1 }
 0x368   :  { %v469_v17 = vadd.f32 %v493_v15, %v468_v16 }
 0x369   :  { %v701_v0 = vpop.f32.mrf.mxu1 }
 0x36a   :  { %472 = vst [vmem:[#allocation11] sm:$0xff] %v469_v17 }
 0x36b   :  { %823 = shalt.err (!%p820_p1)
}
 0x36c   :  { %482 = dma.vmem_to_hbm [thread:$0]  %s480_s17, 128, %s1023_s9, [#allocation4]  }
 0x36d   :  { %838 = dma.done.wait [#allocation4], 128  }
 0x36e   :  { %839 = vsyncadd [#allocation4], 4294967168 }
 0x36f   :  { %486 = vsyncpa [#allocation3], 1 }
 0x370   :  { %487 = vsyncpa [#allocation6], 1 }
 0x371   :  { %488 = vsyncpa [#allocation9], 1 }
 0x372   :  { %489 = vsyncpa [#allocation4], 1 }

</bundles_post_ra>
